<compile_context>
chip_gen: v5e
topology: v5e:2x2
jax: 0.10.0
libtpu: 0.0.40
codegen_flags: <defaults>
</compile_context>

<pallas_src>
import jax
import jax.numpy as jnp
from jax.experimental import pallas as pl
from jax.experimental.pallas import tpu as pltpu

LANE = 128


def _cdiv(a, b):
    return (a + b - 1) // b


def _round_up(x, m):
    return _cdiv(x, m) * m


def _min_sublane(dtype):
    # Minimum second-to-last tile dim: f32 -> 8, bf16/f16 -> 16, int8/fp8 -> 32.
    return max(8, 32 // jnp.dtype(dtype).itemsize)


def _feature_tile(D, cap=512):
    """Largest multiple of 128 that divides D (capped at `cap`), else full D."""
    if D % LANE != 0:
        return D
    t = min((cap // LANE) * LANE, D)
    while D % t != 0:
        t -= LANE
    return t


def _linear_kernel(x_ref, wt_ref, o_ref, acc_ref):
    # x_ref: [TM, TK], wt_ref: [TK, TN] (weight pre-transposed to in x out),
    # o_ref: [TM, TN], acc_ref: f32 [TM, TN].
    @pl.when(pl.program_id(2) == 0)
    def _init():
        acc_ref[...] = jnp.zeros_like(acc_ref)

    acc_ref[...] += jnp.dot(
        x_ref[...], wt_ref[...], preferred_element_type=jnp.float32
    )

    @pl.when(pl.program_id(2) == pl.num_programs(2) - 1)
    def _finalize():
        o_ref[...] = acc_ref[...].astype(o_ref.dtype)


def factor_block_forward(x, w, *, tm=1024, compute_dtype=None):
    """FactorBlock.forward: item_f = x @ w.T  (nn.Linear(dim, dim, bias=False)).

    x: [..., D] activations; w: [D, D] PyTorch weight (out_features x in_features).
    compute_dtype: optional MXU/DMA dtype (e.g. jnp.bfloat16); accumulation is
    always f32 and the output keeps x.dtype.
    """
    orig_shape = x.shape
    D = orig_shape[-1]
    M = 1
    for s in orig_shape[:-1]:
        M *= s
    out_dtype = x.dtype
    out_isz = jnp.dtype(out_dtype).itemsize

    cdt = jnp.dtype(compute_dtype) if compute_dtype is not None else jnp.dtype(x.dtype)
    isz = cdt.itemsize
    sublane = _min_sublane(cdt)

    x2d = x.reshape(M, D)
    # One-off (D, D) transpose so the kernel contracts ((1,), (0,)) -- avoids
    # any chance of a per-grid-step XLU transpose of the resident weight block.
    wt = w.T
    if x2d.dtype != cdt:
        x2d = x2d.astype(cdt)
    if wt.dtype != cdt:
        wt = wt.astype(cdt)

    # Feature (N/K) tiling: lane-dense 128-multiple tiles when D % 128 == 0,
    # otherwise a single full-D block (no column padding -> no byte inflation).
    TN = _feature_tile(D)
    TK = _feature_tile(D)

    # Row tile: as large as a 40 MiB VMEM working-set budget allows (leaves
    # headroom under v7x's 64 MiB per-TC VMEM), multiple of the dtype sublane.
    budget = 40 << 20
    w_resident = 2 * TK * TN * isz                       # weight tile, 2 buffers
    per_row = 2 * TK * isz + 2 * TN * out_isz + TN * 4   # x(2x) + out(2x) + acc
    tm_cap_vmem = max(sublane, (budget - w_resident) // per_row)

    M_al = _round_up(M, sublane)
    TM = min(tm, M_al, tm_cap_vmem)
    TM = max(sublane, (TM // sublane) * sublane)
    # Keep >= 2 steps along the (parallel) M axis when possible so both v7x
    # TensorCores get work; no effect on single-TC v5e/v6e.
    if _cdiv(M_al, TM) < 2 and M_al >= 2 * sublane:
        TM = _round_up(_cdiv(M_al, 2), sublane)

    # Conditional row padding only (skipped entirely when M % TM == 0).
    Mp = _round_up(M, TM)
    if Mp != M:
        x2d = jnp.pad(x2d, ((0, Mp - M), (0, 0)))

    grid = (Mp // TM, D // TN, D // TK)

    vmem_needed = (
        2 * TM * TK * isz         # x tile (double-buffered)
        + 2 * TK * TN * isz       # weight tile (double-buffered)
        + 2 * TM * TN * out_isz   # output tile (double-buffered)
        + TM * TN * 4             # f32 accumulator scratch
    )
    vmem_limit = int(min(48 << 20, max(vmem_needed + (8 << 20), 16 << 20)))

    # NOTE: pipeline_mode=pl.Buffered(...) tweaks (single-buffer the constant-
    # index weight / triple-buffer x+out) were considered but left at the
    # default depth for robustness; the VMEM budget above assumes 2 buffers.
    out_p = pl.pallas_call(
        _linear_kernel,
        out_shape=jax.ShapeDtypeStruct((Mp, D), out_dtype),
        grid_spec=pltpu.PrefetchScalarGridSpec(
            num_scalar_prefetch=0,
            grid=grid,
            in_specs=[
                # Activation row tiles stream through the pipeline.
                pl.BlockSpec((TM, TK), lambda i, j, k: (i, k)),
                # Weight tile; for small D its block index is constant, so it
                # is fetched once and stays VMEM-resident across M steps.
                pl.BlockSpec((TK, TN), lambda i, j, k: (k, j)),
            ],
            out_specs=pl.BlockSpec((TM, TN), lambda i, j, k: (i, j)),
            scratch_shapes=[pltpu.VMEM((TM, TN), jnp.float32)],
        ),
        compiler_params=pltpu.CompilerParams(
            dimension_semantics=("parallel", "parallel", "arbitrary"),
            vmem_limit_bytes=vmem_limit,
        ),
        cost_estimate=pl.CostEstimate(
            flops=2 * M * D * D,
            bytes_accessed=M * D * isz + D * D * isz + M * D * out_isz,
            transcendentals=0,
        ),
    )(x2d, wt)

    out2d = out_p if Mp == M else out_p[:M]
    return out2d.reshape(orig_shape)


def reference_forward(x, w):
    # nn.Linear(bias=False): out[..., e] = sum_d x[..., d] * w[e, d]
    return jnp.einsum("...d,ed->...e", x, w)


if __name__ == "__main__":
    key = jax.random.PRNGKey(0)
    k_x, k_w = jax.random.split(key)

    B, S, D = 2, 8, 32  # batch=2, set size=8, dim=32
    x = jax.random.normal(k_x, (B, S, D), dtype=jnp.float32)
    # Deterministic init of trans_w weight (dim, dim), bias=False.
    bound = 1.0 / (D ** 0.5)
    w = jax.random.uniform(
        k_w, (D, D), minval=-bound, maxval=bound, dtype=jnp.float32
    )

    ref = reference_forward(x, w)

    # f32 path (matches module semantics bit-for-bit up to f32 accumulation).
    out = jax.block_until_ready(factor_block_forward(x, w))
    assert out.shape == (B, S, D)
    assert out.dtype == x.dtype
    assert jnp.allclose(out, ref, atol=1e-5, rtol=1e-5)

    # Optional bf16 MXU/DMA path (halves HBM bytes); f32 accumulation, looser tol.
    out_bf16 = jax.block_until_ready(
        factor_block_forward(x, w, compute_dtype=jnp.bfloat16)
    )
    assert out_bf16.shape == (B, S, D)
    assert jnp.allclose(out_bf16, ref, atol=5e-2, rtol=5e-2)

    print("KERNEL_OK")
</pallas_src>

<mosaic_0001>
module attributes {stable_mosaic.version = 11 : i64} {
  func.func @_linear_kernel(%arg0: i32, %arg1: i32, %arg2: i32, %arg3: memref<8x32xf32, #tpu.memory_space<vmem>>, %arg4: memref<32x32xf32, #tpu.memory_space<vmem>>, %arg5: memref<8x32xf32, #tpu.memory_space<vmem>>, %arg6: memref<8x32xf32, #tpu.memory_space<vmem>>) attributes {dimension_semantics = [#tpu.dimension_semantics<parallel>, #tpu.dimension_semantics<parallel>, #tpu.dimension_semantics<arbitrary>], iteration_bounds = array<i64: 2, 1, 1>, scalar_prefetch = 0 : i64, scratch_operands = 1 : i64, tpu.core_type = #tpu.core_type<tc>, window_params = [{transform_indices = @transform_0, window_bounds = array<i64: 8, 32>}, {transform_indices = @transform_1, window_bounds = array<i64: 32, 32>}, {transform_indices = @transform_2, window_bounds = array<i64: 8, 32>}]} {
    %c0_i32 = arith.constant 0 : i32
    %0 = arith.cmpi eq, %arg2, %c0_i32 : i32
    %1 = arith.extui %0 : i1 to i32
    %c0_i32_0 = arith.constant 0 : i32
    %2 = arith.cmpi ne, %1, %c0_i32_0 : i32
    scf.if %2 {
      %cst_10 = arith.constant 0.000000e+00 : f32
      %12 = vector.broadcast %cst_10 : f32 to vector<8x32xf32>
      %c0_11 = arith.constant 0 : index
      %c0_12 = arith.constant 0 : index
      %13 = vector.load %arg6[%c0_11, %c0_12] : memref<8x32xf32, #tpu.memory_space<vmem>>, vector<8x32xf32>
      tpu.vector_store %arg6[%c0_11, %c0_12], %12 {strides = array<i32>} : memref<8x32xf32, #tpu.memory_space<vmem>>, vector<8x32xf32>,
    } else {
    }
    %c0 = arith.constant 0 : index
    %c0_1 = arith.constant 0 : index
    %3 = vector.load %arg6[%c0, %c0_1] : memref<8x32xf32, #tpu.memory_space<vmem>>, vector<8x32xf32>
    %c0_2 = arith.constant 0 : index
    %c0_3 = arith.constant 0 : index
    %4 = vector.load %arg3[%c0_2, %c0_3] : memref<8x32xf32, #tpu.memory_space<vmem>>, vector<8x32xf32>
    %c0_4 = arith.constant 0 : index
    %c0_5 = arith.constant 0 : index
    %5 = vector.load %arg4[%c0_4, %c0_5] : memref<32x32xf32, #tpu.memory_space<vmem>>, vector<32x32xf32>
    %cst = arith.constant dense<0.000000e+00> : vector<8x32xf32>
    %6 = tpu.matmul %4, %5, %cst {dimension_numbers = #tpu.dot_dimension_numbers<[1], [0], [0], [1], [0, 0, 1, 1], [], []>} : vector<8x32xf32>, vector<32x32xf32>, vector<8x32xf32> -> vector<8x32xf32>
    %7 = arith.addf %3, %6 : vector<8x32xf32>
    %c0_6 = arith.constant 0 : index
    %c0_7 = arith.constant 0 : index
    %8 = vector.load %arg6[%c0_6, %c0_7] : memref<8x32xf32, #tpu.memory_space<vmem>>, vector<8x32xf32>
    tpu.vector_store %arg6[%c0_6, %c0_7], %7 {strides = array<i32>} : memref<8x32xf32, #tpu.memory_space<vmem>>, vector<8x32xf32>,
    %c0_i32_8 = arith.constant 0 : i32
    %9 = arith.cmpi eq, %arg2, %c0_i32_8 : i32
    %10 = arith.extui %9 : i1 to i32
    %c0_i32_9 = arith.constant 0 : i32
    %11 = arith.cmpi ne, %10, %c0_i32_9 : i32
    scf.if %11 {
      %c0_10 = arith.constant 0 : index
      %c0_11 = arith.constant 0 : index
      %12 = vector.load %arg6[%c0_10, %c0_11] : memref<8x32xf32, #tpu.memory_space<vmem>>, vector<8x32xf32>
      %c0_12 = arith.constant 0 : index
      %c0_13 = arith.constant 0 : index
      %13 = vector.load %arg5[%c0_12, %c0_13] : memref<8x32xf32, #tpu.memory_space<vmem>>, vector<8x32xf32>
      tpu.vector_store %arg5[%c0_12, %c0_13], %12 {strides = array<i32>} : memref<8x32xf32, #tpu.memory_space<vmem>>, vector<8x32xf32>,
    } else {
    }
    return
  }
  func.func @transform_0(%arg0: i32, %arg1: i32, %arg2: i32) -> (i32, i32) {
    %c0_i32 = arith.constant 0 : i32
    return %arg0, %arg2 : i32, i32
  }
  func.func @transform_1(%arg0: i32, %arg1: i32, %arg2: i32) -> (i32, i32) {
    %c0_i32 = arith.constant 0 : i32
    return %arg2, %arg1 : i32, i32
  }
  func.func @transform_2(%arg0: i32, %arg1: i32, %arg2: i32) -> (i32, i32) {
    %c0_i32 = arith.constant 0 : i32
    return %arg0, %arg1 : i32, i32
  }
}

</mosaic_0001>

<bundles_post_ra>
// kernel: tpu_custom_call.1
= control target key start
LH: loop header
LB: loop body
LE: loop exit
PB: predicated region body
PF: predicated region fallthrough
CT: control target
= control target key end

     0   :  { %7 = vsyncpa [#allocation4], 0  ;;  %s777_s0 = inlined_call_operand.hbm [shape: f32[16,32], index: 0, kind: input, shape index: {}]   ;;  %s778_s1 = inlined_call_operand.hbm [shape: f32[32,32], index: 1, kind: input, shape index: {}]   ;;  %s779_s2 = inlined_call_operand.hbm [shape: f32[16,32], index: 2, kind: output, shape index: {}]  }
   0x1   :  { %9 = vsyncpa [#allocation4 + $0x1], 0 }
   0x2   :  { %10 = vsyncpa [#allocation7], 0 }
   0x3   :  { %11 = vsyncpa [#allocation5], 0 }
   0x4   :  { %13 = vsyncpa [#allocation5 + $0x1], 0  ;;  %s630_s9 = smov 0   ;;  %s632_s10 = smov 0  }
   0x5   :  { %s634_s11 = smov 0   ;;  %s636_s12 = smov 0  }
   0x6   :  { %s638_s13 = smov 0   ;;  %s640_s14 = smov 0  }
   0x7 LB: > { %s371_s15 = sadd.s32 4294967295, %s609_s14   ;;  %p373_p0 = scmp.ge.s32.totalorder %s609_s14, 1  ;;  %s609_s14 = sphi %s640_s14, %s19_s14   ;;  %s605_s13 = sphi %s638_s13, %s790_s13   ;;  %s601_s12 = sphi %s636_s12, %s789_s12   ;;  %s597_s11 = sphi %s634_s11, %s788_s11   ;;  %s593_s10 = sphi %s632_s10, %s787_s10   ;;  %s589_s9 = sphi %s630_s9, %s786_s9  }
   0x8   : > { %p662_p1 = scmp.eq.s32.totalorder %s371_s15, 0  ;;  %p127_p2 = scmp.lt.s32.totalorder %s609_s14, 3 }
   0x9   : > { %s142_s19 = sshll.u32 %s778_s1, 4  ;;  %s611_s21 = smov [#allocation6]   ;;  %s143_s19 = int_to_ptr.hbm [resolvable:$true] %s142_s19 }
   0xa   : > { %p670_p3 = pnand %p373_p0, %p127_p2  ;;  %s144_s22 = sshll.u32 %s611_s21, 4  ;;  %s145_s22 = int_to_ptr.vmem [resolvable:$true] %s144_s22 }
   0xb   : > { %p375_p6 = scmp.ge.s32.totalorder %s609_s14, 2  ;;  %s612_s23 = smov 128  }
   0xc   : > { %p395_p4 = pneg %p670_p3  ;;  %s613_s24 = smov 8  }
   0xd   : > { %s372_s25 = sadd.s32 4294967294, %s609_s14   ;;  %s38_s26 = sadd.s32 1, %s605_s13 }
   0xe   : > { %p396_p5 = pnand %p395_p4, %p662_p1  ;;  %s47_s27 = sadd.s32 1, %s597_s11 }
   0xf   : > { %p40_p7 = scmp.ge.s32.totalorder %s38_s26, 2  ;;  %p54_p8 = scmp.ne.s32.totalorder %s597_s11, %s593_s10 }
  0x10   : > { %398 = dma.hbm_to_vmem [thread:$0]  (!%p396_p5), %s143_s19, 512, %s145_s22, [#allocation7], %s612_s23, %s612_s23, %s613_s24  }
  0x11   : > { %p55_p9 = scmp.eq.s32.totalorder %s609_s14, 0  ;;  %p60_p10 = scmp.ne.s32.totalorder %s593_s10, %s589_s9 }
  0x12   : > { %s792_s26 = smov (%p40_p7, %s38_s26), 0  ;;  %p114_p13 = scmp.eq.s32.totalorder %s371_s15, 1 }
  0x13   : > { %p689_p11 = por %p55_p9, %p54_p8  ;;  %p695_p12 = por %p662_p1, %p60_p10 }
  0x14   : > { %s42_s30 = ssub.s32 %s605_s13, %s792_s26  ;;  %p120_p2 = scmp.eq.s32.totalorder %s372_s25, 1 }
  0x15   : > { %p45_p0 = scmp.eq.s32.totalorder %s42_s30, 0  ;;  %p701_p4 = por %p114_p13, %p54_p8 }
  0x16   : > { %p408_p5 = scmp.lt.s32.totalorder %s609_s14, 2  ;;  %p709_p7 = por %p120_p2, %p60_p10 }
  0x17   : > { %s707_s4 = scalar_select %p45_p0, %s597_s11, %s47_s27  }
  0x18   : > { %s158_s6 = sand.u32 1, %s597_s11   ;;  %s377_s8 = sshll.u32 %s605_s13, 3 }
  0x19   : > { %s376_s7 = sshll.u32 %s158_s6, 3  ;;  %s167_s15 = scalar_lea.hbm %s777_s0, %s377_s8 }
  0x1a   : > { %s162_s19 = scalar_lea.vmem [#allocation3], %s376_s7  ;;  %s169_s22 = sshll.u32 %s167_s15, 4  ;;  %s170_s22 = int_to_ptr.hbm [resolvable:$true] %s169_s22 }
  0x1b   : > { %s171_s21 = sshll.u32 %s162_s19, 4  ;;  %p400_p8 = pnand %p408_p5, %p689_p11  ;;  %s172_s21 = int_to_ptr.vmem [resolvable:$true] %s171_s21 }
  0x1c   : > { %s159_s23 = scalar_lea.sflag [#allocation4], %s158_s6  ;;  %180 = sbr.rel (%p670_p3) target bundleno = 183 (0xb7), region = 28 }
  0x1d   : > { %402 = dma.hbm_to_vmem [thread:$0]  (!%p400_p8), %s170_s22, 128, %s172_s21, %s159_s23  }
  0x1e   : > { %s723_s24 = sand.u32 (!%p670_p3), 1, %s593_s10  }
  0x1f   : > { %s379_s25 = sshll.u32 (!%p670_p3), %s723_s24, 3  ;;  %s183_s27 = scalar_lea.sflag (!%p670_p3), [#allocation4], %s723_s24 }
  0x20   : > { %s186_s30 = scalar_lea.vmem (!%p670_p3), [#allocation3], %s379_s25 }
  0x21   : > { %576 = dma.done.wait (%p695_p12), %s183_s27, 128  }
  0x22   : > { %578 = vsyncadd (%p695_p12), %s183_s27, 4294967168 }
  0x23   : > { %580 = dma.done.wait (%p662_p1), [#allocation7], 512  }
  0x24   : > { %582 = vsyncadd (%p662_p1), [#allocation7], 4294966784  ;;  %vm218_vm0 = vcmask 261120   ;;  %v614_v0 = vmov 0.0   ;;  %v225_v1 = vld [vmem:[#allocation6 + $0x18] sm:$0xff]  ;;  %v224_v2 = vld [vmem:[#allocation6 + $0x10] sm:$0xff] }
  0x25   : > { %219 = vst.msk [vmem:[#allocation2] sm:$0xff] %vm218_vm0, %v614_v0  ;;  %242 = vmatpush.msra.mxu0 %v225_v1  ;;  %v223_v3 = vld [vmem:[#allocation6 + $0x8] sm:$0xff]  ;;  %v222_v4 = vld [vmem:[#allocation6] sm:$0xff]  ;;  %v221_v5 = vld [vmem:[%s186_s30] sm:$0xff]  ;;  %s384_s16 = sshll.u32 %s601_s12, 3  ;;  %s212_s6 = scalar_lea.vmem [#allocation8], %s379_s25 }
  0x26   : > { %s269_s29 = scalar_lea.hbm %s779_s2, %s384_s16  ;;  %s271_s7 = sshll.u32 %s212_s6, 4  ;;  %s272_s7 = int_to_ptr.vmem [resolvable:$true] %s271_s7 }
  0x27   : > { %243 = vmatpush.msra.mxu0 %v224_v2  ;;  %s273_s8 = sshll.u32 %s269_s29, 4  ;;  %s258_s17 = scalar_lea.sflag [#allocation5], %s723_s24  ;;  %s274_s8 = int_to_ptr.hbm [resolvable:$true] %s273_s8 }
  0x28   : > { %s537_s18 = sshra.s32 %s274_s8, 4  ;;  %s543_s21 = scalar_lea.hbm %s779_s2, 16  ;;  %s538_s18 = int_to_ptr.hbm [resolvable:$true] %s537_s18 }
  0x29   : > { %244 = vmatpush.msra.mxu0 %v223_v3  ;;  %s539_s12 = scalar_lea.hbm %s538_s18, 8  ;;  %p544_p10 = scmp.lt.s32.totalorder %s538_s18, %s779_s2 }
  0x2a   : > { %p540_p1 = scmp.ne.s32.totalorder %s538_s18, %s539_s12  ;;  %p545_p11 = scmp.lt.s32.totalorder %s543_s21, %s539_s12 }
  0x2b   : > { %245 = vmatpush.msra.mxu0 %v222_v4 }
  0x2c   : > { %382 = vmatmul.msk.f32.vlgmr.msra.gmra.mxu0 %vm218_vm0, %v221_v5  ;;  %v220_v6 = vld [vmem:[#allocation2] sm:$0xff]  ;;  %p541_p3 = pnand %p540_p1, %p701_p4  ;;  %p546_p12 = por %p545_p11, %p544_p10 }
  0x2e   : > { %p542_p9 = pneg %p541_p3 }
  0x30   : > { %p547_p13 = pnand %p546_p12, %p542_p9 }
  0xa9   : > { %v247_v7 = vpop.f32.mrf.mxu0 }
  0xaa   : > { %v250_v8 = vadd.f32 %v247_v7, %v220_v6 }
  0xac   : > { %251 = vst.msk [vmem:[#allocation2] sm:$0xff] %vm218_vm0, %v250_v8 }
  0xb3   : > { %v255_v9 = vld [vmem:[#allocation2] sm:$0xff] }
  0xb4   : > { %256 = vst.msk [vmem:[%s212_s6] sm:$0xff] %vm218_vm0, %v255_v9 }
  0xb5   : > { %550 = shalt.err (!%p547_p13)
}
  0xb6   : > { %393 = dma.vmem_to_hbm [thread:$0]  (%p701_p4), %s272_s7, 128, %s274_s8, %s258_s17  }
  0xb7 PF: > { %s285_s24 = sand.u32 1, %s589_s9   ;;  %p404_p0 = pnand %p375_p6, %p709_p7 }
  0xb8   : > { %s286_s25 = scalar_lea.sflag [#allocation5], %s285_s24 }
  0xb9   : > { %p405_p2 = pneg %p404_p0 }
  0xbb   : > { %584 = dma.done.wait (%p405_p2), %s286_s25, 128  }
  0xbc   : > { %586 = vsyncadd (%p405_p2), %s286_s25, 4294967168  ;;  %s19_s14 = sadd.s32 1, %s609_s14   ;;  %s786_s9 = smov %s593_s10 }
  0xbd   : > { %p16_p5 = scmp.ge.s32.totalorder %s19_s14, 4   ;;  %s787_s10 = smov %s597_s11 }
  0xbe   : > { %s788_s11 = smov %s707_s4  ;;  %s789_s12 = smov %s605_s13 }
  0xbf   : > { %s790_s13 = smov %s792_s26  ;;  %18 = sbr.rel (!%p16_p5) target bundleno = 7 (0x7), region = 86 }
  0xc4   :  { %292 = vsyncpa [#allocation4], 1 }
  0xc5   :  { %294 = vsyncpa [#allocation4 + $0x1], 1 }
  0xc6   :  { %295 = vsyncpa [#allocation7], 1 }
  0xc7   :  { %296 = vsyncpa [#allocation5], 1 }
  0xc8   :  { %298 = vsyncpa [#allocation5 + $0x1], 1 }

</bundles_post_ra>
